<compile_context>
chip_gen: v7x
topology: tpu7x:2x2x1
jax: 0.10.0
libtpu: 0.0.40
codegen_flags: <defaults>
</compile_context>

<pallas_src>
import jax
import jax.numpy as jnp
from jax.experimental import pallas as pl
from jax.experimental.pallas import tpu as pltpu

_LANES = 128


def _sublanes(dtype) -> int:
    # Sublane packing granularity per dtype width (second-minor dim multiple).
    return {4: 8, 2: 16, 1: 32}.get(jnp.dtype(dtype).itemsize, 8)


def _minmax_kernel(params_ref, x_ref, o_ref):
    # params_ref: SMEM f32[2] = [scale, offset]
    s = params_ref[0]
    off = params_ref[1]
    # f32 math (no-op upcast for f32 inputs; correct on v5e which lacks bf16
    # VALU).  The kernel is HBM-bound, so the extra VALU work is free slack.
    o_ref[...] = (x_ref[...].astype(jnp.float32) * s + off).astype(o_ref.dtype)


def min_max_norm(x, min_v, max_v, a_v=0.0, b_v=1.0, *,
                 row_tile=8192, min_pallas_bytes=1 << 20):
    """Pallas TPU implementation of MinMaxNorm.forward for arbitrary-shape x."""
    x = jnp.asarray(x)
    orig_shape = x.shape
    out_dtype = x.dtype if jnp.issubdtype(x.dtype, jnp.floating) else jnp.float32

    # Fold the affine transform into one multiply-add.  jnp ops (not float())
    # so traced device scalars work and changing values never retraces.
    mn = jnp.asarray(min_v, jnp.float32)
    mx = jnp.asarray(max_v, jnp.float32)
    av = jnp.asarray(a_v, jnp.float32)
    bv = jnp.asarray(b_v, jnp.float32)
    scale = (bv - av) / (mx - mn)          # NOTE: max == min -> inf/nan (as in module)
    offset = av - mn * scale

    total = int(x.size)
    itemsize = jnp.dtype(x.dtype).itemsize
    nbytes = total * itemsize

    pallas_ok = (
        total > 0
        and total % _LANES == 0            # free metadata reshape to (rows, 128)
        and out_dtype == x.dtype           # floating input
        and itemsize in (2, 4)             # f32 / bf16 / f16
        and nbytes >= min_pallas_bytes     # big enough to beat fused-XLA dispatch
    )
    if not pallas_ok:
        # Single fused XLA elementwise pass: 1 read + 1 write, no pad/slice/concat
        # copies, no per-call dispatch overhead.  Optimal for small or lane-ragged
        # tensors on every TPU generation.
        return (x.astype(jnp.float32) * scale + offset).astype(out_dtype)

    sub = _sublanes(x.dtype)
    n_rows = total // _LANES
    slab = x.reshape(n_rows, _LANES)       # metadata-only (total % 128 == 0)

    # Tile sizing: biggest block that amortizes per-step overhead, clamped to
    # the slab, kept a multiple of the dtype's sublane pack, and (for inputs
    # >= 8 MiB) forced to >= 4 grid steps so megacore sharding has work.
    tile = min(int(row_tile), n_rows)
    if nbytes >= (8 << 20):
        tile = min(tile, pl.cdiv(n_rows, 4))
    tile = max(sub, (tile // sub) * sub)

    block_bytes = tile * _LANES * itemsize
    # Double-buffered input + output blocks plus headroom for internal scratch.
    # >= 32 MiB (covers v5e's 16 MiB default scoped limit), capped at 64 MiB
    # (v7x physical VMEM).
    vmem_limit = int(min(64 << 20, max(32 << 20, 4 * block_bytes + (8 << 20))))

    grid = (pl.cdiv(n_rows, tile),)        # partial last block masked by Pallas
    params = jnp.stack([scale, offset])    # f32[2] -> SMEM

    out = pl.pallas_call(
        _minmax_kernel,
        out_shape=jax.ShapeDtypeStruct((n_rows, _LANES), out_dtype),
        grid_spec=pltpu.PrefetchScalarGridSpec(
            num_scalar_prefetch=0,
            grid=grid,
            in_specs=[
                pl.BlockSpec(memory_space=pltpu.MemorySpace.SMEM),   # [scale, offset]
                pl.BlockSpec((tile, _LANES), lambda i: (i, 0)),      # x slab
            ],
            out_specs=pl.BlockSpec((tile, _LANES), lambda i: (i, 0)),
        ),
        compiler_params=pltpu.CompilerParams(
            dimension_semantics=("parallel",),
            vmem_limit_bytes=vmem_limit,
        ),
    )(params, slab)

    return out.reshape(orig_shape)


if __name__ == "__main__":
    key = jax.random.PRNGKey(0)
    k0, k1, k2, k3 = jax.random.split(key, 4)

    # Module params (from __init__ signature).
    min_v, max_v, a_v, b_v = -5.0, 25.0, 0.0, 1.0
    scale = (b_v - a_v) / (max_v - min_v)

    def ref(z):
        return (a_v + (z.astype(jnp.float32) - min_v) * scale).astype(z.dtype)

    # 1) Small NCHW input (2,4,16,16); force the Pallas path for the demo
    #    (the default heuristic would route such a tiny tensor to fused XLA).
    x = jax.random.uniform(k0, (2, 4, 16, 16), jnp.float32, -5.0, 25.0)
    y = jax.block_until_ready(
        min_max_norm(x, min_v, max_v, a_v, b_v, min_pallas_bytes=0))
    assert y.shape == x.shape and y.dtype == x.dtype
    assert jnp.allclose(y, ref(x), atol=1e-6, rtol=1e-6)

    # 2) Multi-step grid with a partial boundary block (1200 rows, tile 512,
    #    grid = 3) -- exercises the cdiv boundary masking path.
    x2 = jax.random.uniform(k1, (2, 600, 128), jnp.float32, -5.0, 25.0)
    y2 = jax.block_until_ready(
        min_max_norm(x2, min_v, max_v, a_v, b_v, row_tile=512, min_pallas_bytes=0))
    assert jnp.allclose(y2, ref(x2), atol=1e-6, rtol=1e-6)

    # 3) bf16 input -- exercises the dtype-aware 16-row sublane granularity.
    x3 = jax.random.uniform(k2, (2, 4, 16, 16), jnp.float32, -5.0, 25.0
                            ).astype(jnp.bfloat16)
    y3 = jax.block_until_ready(
        min_max_norm(x3, min_v, max_v, a_v, b_v, min_pallas_bytes=0))
    ref3 = ((x3.astype(jnp.float32) - min_v) * scale + a_v).astype(jnp.bfloat16)
    assert y3.dtype == jnp.bfloat16 and y3.shape == x3.shape
    assert jnp.allclose(y3.astype(jnp.float32), ref3.astype(jnp.float32),
                        atol=2e-2, rtol=2e-2)

    # 4) Ragged small input -> plain fused XLA fallback path.
    x4 = jax.random.uniform(k3, (3, 5, 7), jnp.float32, -5.0, 25.0)
    y4 = jax.block_until_ready(min_max_norm(x4, min_v, max_v, a_v, b_v))
    assert jnp.allclose(y4, ref(x4), atol=1e-6, rtol=1e-6)

    print("KERNEL_OK")
</pallas_src>

<mosaic_0001>
module attributes {stable_mosaic.version = 11 : i64} {
  func.func @_minmax_kernel(%arg0: i32, %arg1: memref<2xf32, #tpu.memory_space<smem>>, %arg2: memref<16x128xf32, #tpu.memory_space<vmem>>, %arg3: memref<16x128xf32, #tpu.memory_space<vmem>>) attributes {dimension_semantics = [#tpu.dimension_semantics<parallel>], iteration_bounds = array<i64: 1>, scalar_prefetch = 0 : i64, scratch_operands = 0 : i64, tpu.core_type = #tpu.core_type<tc>, window_params = [{transform_indices = @transform_0, window_bounds = array<i64: 2>}, {transform_indices = @transform_1, window_bounds = array<i64: 16, 128>}, {transform_indices = @transform_2, window_bounds = array<i64: 16, 128>}]} {
    %c0 = arith.constant 0 : index
    %0 = memref.load %arg1[%c0] : memref<2xf32, #tpu.memory_space<smem>>
    %c1 = arith.constant 1 : index
    %1 = memref.load %arg1[%c1] : memref<2xf32, #tpu.memory_space<smem>>
    %c0_0 = arith.constant 0 : index
    %c0_1 = arith.constant 0 : index
    %2 = vector.load %arg2[%c0_0, %c0_1] : memref<16x128xf32, #tpu.memory_space<vmem>>, vector<16x128xf32>
    %3 = vector.broadcast %0 : f32 to vector<16x128xf32>
    %4 = arith.mulf %2, %3 : vector<16x128xf32>
    %5 = vector.broadcast %1 : f32 to vector<16x128xf32>
    %6 = arith.addf %4, %5 : vector<16x128xf32>
    %c0_2 = arith.constant 0 : index
    %c0_3 = arith.constant 0 : index
    %7 = vector.load %arg3[%c0_2, %c0_3] : memref<16x128xf32, #tpu.memory_space<vmem>>, vector<16x128xf32>
    tpu.vector_store %arg3[%c0_2, %c0_3], %6 {strides = array<i32>} : memref<16x128xf32, #tpu.memory_space<vmem>>, vector<16x128xf32>,
    return
  }
  func.func @transform_0(%arg0: i32) -> i32 {
    %c0_i32 = arith.constant 0 : i32
    %c0_i32_0 = arith.constant 0 : i32
    return %c0_i32 : i32
  }
  func.func @transform_1(%arg0: i32) -> (i32, i32) {
    %c0_i32 = arith.constant 0 : i32
    %c0_i32_0 = arith.constant 0 : i32
    return %arg0, %c0_i32 : i32, i32
  }
  func.func @transform_2(%arg0: i32) -> (i32, i32) {
    %c0_i32 = arith.constant 0 : i32
    %c0_i32_0 = arith.constant 0 : i32
    return %arg0, %c0_i32 : i32, i32
  }
}

</mosaic_0001>

<bundles_post_ra>
// kernel: tpu_custom_call.1
= control target key start
LH: loop header
LB: loop body
LE: loop exit
PB: predicated region body
PF: predicated region fallthrough
CT: control target
= control target key end

     0   :  { %7 = vsyncpa [#allocation5], 0  ;;  %s195_s0 = inlined_call_operand.hbm [shape: f32[2], index: 0, kind: input, shape index: {}]   ;;  %s196_s1 = inlined_call_operand.hbm [shape: f32[16,128], index: 1, kind: input, shape index: {}]   ;;  %s197_s2 = inlined_call_operand.hbm [shape: f32[16,128], index: 2, kind: output, shape index: {}]  }
   0x1   :  { %8 = vsyncpa [#allocation3], 0 }
   0x2   :  { %9 = vsyncpa [#allocation4], 0  ;;  %s73_s11 = scalar_lea.hbm %s195_s0, 16 }
   0x3   :  { %p74_p0 = scmp.ne.s32.totalorder %s195_s0, %s73_s11  ;;  %p77_p1 = scmp.lt.u32.totalorder %s73_s11, %s195_s0 }
   0x5   :  { %p79_p2 = pnand %p77_p1, %p74_p0 }
   0x7   :  { %82 = shalt.err (!%p79_p2)
}
   0x8   :  { %s133_s16 = smov [#allocation2]   ;;  %s134_s19 = smov [#allocation6]  }
   0x9   :  { %17 = dma.hbm_to_smem %s195_s0, 16, %s133_s16, [#allocation5]  }
   0xa   :  { %s23_s20 = sshll.u32 %s134_s19, 4  ;;  %s83_s23 = scalar_lea.hbm %s196_s1, 256  ;;  %s24_s20 = int_to_ptr.vmem [resolvable:$true] %s23_s20 }
   0xb   :  { %p84_p3 = scmp.ne.s32.totalorder %s196_s1, %s83_s23  ;;  %p87_p4 = scmp.lt.u32.totalorder %s83_s23, %s196_s1 }
   0xd   :  { %p89_p5 = pnand %p87_p4, %p84_p3 }
   0xf   :  { %92 = shalt.err (!%p89_p5)
}
  0x10   :  { %s93_s28 = scalar_lea.vmem %s24_s20, 256  ;;  %p98_p7 = scmp.lt.s32.totalorder %s24_s20, %s24_s20 }
  0x11   :  { %p94_p6 = scmp.ne.s32.totalorder %s24_s20, %s93_s28  ;;  %p99_p8 = scmp.lt.s32.totalorder %s93_s28, %s93_s28 }
  0x13   :  { %p100_p9 = por %p99_p8, %p98_p7 }
  0x15   :  { %p101_p10 = pnand %p100_p9, %p94_p6 }
  0x17   :  { %104 = shalt.err (!%p101_p10)
}
  0x18   :  { %s135_s0 = smov 128   ;;  %s136_s29 = smov 8  }
  0x19   :  { %29 = dma.hbm_to_vmem [thread:$0]  %s196_s1, 256, %s24_s20, [#allocation3], %s135_s0, %s135_s0, %s136_s29  }
  0x1a   :  { %127 = dma.done.wait [#allocation5], 16  }
  0x1b   :  { %128 = vsyncadd [#allocation5], 4294967280 }
  0x1c   :  { %129 = dma.done.wait [#allocation3], 256  }
  0x1d   :  { %130 = vsyncadd [#allocation3], 4294967040 }
  0x1e   :  { %36 = sfence }
  0x1f   :  { %s37_s4 = sld [smem:[#allocation2]]  ;;  %s67_s5 = sld [smem:[#allocation2 + $0x1]]  ;;  %v39_v0 = vld [vmem:[#allocation6] sm:$0xff]  ;;  %v40_v1 = vld [vmem:[#allocation6 + $0x8] sm:$0xff] }
  0x20   :  { %s137_s6 = smov [#allocation7]  }
  0x21   :  { %s54_s7 = sshll.u32 %s137_s6, 4  ;;  %s55_s7 = int_to_ptr.vmem [resolvable:$true] %s54_s7 }
  0x22   :  { %s105_s1 = scalar_lea.vmem %s55_s7, 256  ;;  %p110_p12 = scmp.lt.s32.totalorder %s55_s7, %s55_s7 }
  0x23   :  { %p106_p11 = scmp.ne.s32.totalorder %s55_s7, %s105_s1  ;;  %p111_p13 = scmp.lt.s32.totalorder %s105_s1, %s105_s1 }
  0x25   :  { %v41_v2 = vstv %s37_s4  ;;  %v44_v3 = vstv %s67_s5  ;;  %p112_p0 = por %p111_p13, %p110_p12 }
  0x26   :  { %v42_v4 = vmul.f32 %v41_v2, %v39_v0  ;;  %v43_v5 = vmul.f32 %v41_v2, %v40_v1 }
  0x27   :  { %p113_p1 = pnand %p112_p0, %p106_p11 }
  0x28   :  { %v45_v6 = vadd.f32 %v44_v3, %v42_v4  ;;  %v46_v7 = vadd.f32 %v44_v3, %v43_v5 }
  0x2a   :  { %47 = vst [vmem:[#allocation7] sm:$0xff] %v45_v6  ;;  %48 = vst [vmem:[#allocation7 + $0x8] sm:$0xff] %v46_v7 }
  0x2b   :  { %116 = shalt.err (!%p113_p1)
}
  0x2c   :  { %s117_s10 = scalar_lea.hbm %s197_s2, 256 }
  0x2d   :  { %p118_p2 = scmp.ne.s32.totalorder %s197_s2, %s117_s10  ;;  %p121_p3 = scmp.lt.u32.totalorder %s117_s10, %s197_s2 }
  0x2f   :  { %p123_p4 = pnand %p121_p3, %p118_p2 }
  0x31   :  { %126 = shalt.err (!%p123_p4)
}
  0x32   :  { %60 = dma.vmem_to_hbm [thread:$0]  %s55_s7, 256, %s197_s2, [#allocation4], %s135_s0, %s135_s0, %s136_s29  }
  0x33   :  { %131 = dma.done.wait [#allocation4], 256  }
  0x34   :  { %132 = vsyncadd [#allocation4], 4294967040 }
  0x35   :  { %64 = vsyncpa [#allocation3], 1 }
  0x36   :  { %65 = vsyncpa [#allocation4], 1 }
  0x37   :  { %66 = vsyncpa [#allocation5], 1 }

</bundles_post_ra>
